<compile_context>
chip_gen: v6e
topology: v6e:2x2x1
jax: 0.10.0
libtpu: 0.0.40
codegen_flags: <defaults>
</compile_context>

<pallas_src>
import functools

import jax
import jax.numpy as jnp
from jax import lax
from jax.experimental import pallas as pl
from jax.experimental.pallas import tpu as pltpu

EMBEDDING_SIZE = 64
HEAD_SIZE = 16
LANES = 128


def _round_up(x, m):
    return ((x + m - 1) // m) * m


def _attention_kernel(x_ref, w_ref, o_ref, *, bt, t, e, h, qk_cols, v_cols):
    # x_ref block: (bt, t, e). Fold batch into matmul rows for the projection.
    x2d = x_ref[...].reshape(bt * t, e)                          # (bt*t, e)

    # Single fused projection: lanes [0:h]=q (pre-scaled), [h:2h]=k,
    # [qk_cols:qk_cols+e]=v, remaining lanes are zero padding.
    proj = jnp.dot(x2d, w_ref[...],
                   preferred_element_type=jnp.float32)           # (bt*t, qk_cols+v_cols)

    q = proj[:, 0:h].reshape(bt, t, h)                           # already * 1/sqrt(h)
    k = proj[:, h:2 * h].reshape(bt, t, h)
    v = proj[:, qk_cols:qk_cols + v_cols].reshape(bt, t, v_cols)  # zero-padded past e

    # Scores: contract last dims of q and k directly (no explicit transpose).
    s = jnp.einsum('bqh,bkh->bqk', q, k,
                   preferred_element_type=jnp.float32)           # (bt, t, t)

    # Causal mask (strict upper triangle -> -inf), as torch.triu(..., diagonal=1).
    # TODO(synk): for large T, tile K/V with an online-softmax (flash) accumulator
    # instead of materializing the full (T,T) score block (v7x VMEM is 64 MiB).
    row = lax.broadcasted_iota(jnp.int32, (bt, t, t), 1)
    col = lax.broadcasted_iota(jnp.int32, (bt, t, t), 2)
    s = jnp.where(col > row, -jnp.inf, s)

    # Numerically stable softmax; reciprocal runs on the otherwise-idle EUP.
    m = jnp.max(s, axis=-1, keepdims=True)
    p = jnp.exp(s - m)
    p = p * pl.reciprocal(jnp.sum(p, axis=-1, keepdims=True), approx=True)

    # Weighted values. v is lane-padded to v_cols (>=128) so the final store is
    # a full-width (unmasked) vst; the wrapper slices the padding away.
    out = jnp.einsum('bqk,bkd->bqd', p, v,
                     preferred_element_type=jnp.float32)         # (bt, t, v_cols)
    o_ref[...] = out.astype(o_ref.dtype)


def self_attention(x, wq, wk, wv):
    B, T, E = x.shape
    H = wq.shape[1]
    assert wq.shape == (E, H) and wk.shape == (E, H) and wv.shape == (E, E)

    # --- Fused, pre-scaled, lane-padded QKV weight (built once, outside kernel) ---
    scale = 1.0 / (H ** 0.5)            # 0.25 for H=16 (exact power of two)
    qk_cols = _round_up(2 * H, LANES)   # 128
    v_cols = _round_up(E, LANES)        # 128
    w_fused = jnp.zeros((E, qk_cols + v_cols), x.dtype)
    w_fused = w_fused.at[:, 0:H].set(wq * scale)
    w_fused = w_fused.at[:, H:2 * H].set(wk)
    w_fused = w_fused.at[:, qk_cols:qk_cols + E].set(wv)

    # 2-way parallel batch split keeps both v7x TensorCores busy; on single-TC
    # v5e/v6e it costs only one extra (cheap) grid step. Each step processes
    # Bt batches with batch folded into matmul rows.
    num_blocks = 2 if (B >= 2 and B % 2 == 0) else 1
    Bt = B // num_blocks

    kernel = functools.partial(_attention_kernel, bt=Bt, t=T, e=E, h=H,
                               qk_cols=qk_cols, v_cols=v_cols)

    out_padded = pl.pallas_call(
        kernel,
        out_shape=jax.ShapeDtypeStruct((B, T, v_cols), x.dtype),
        grid_spec=pltpu.PrefetchScalarGridSpec(
            num_scalar_prefetch=0,
            grid=(num_blocks,),
            in_specs=[
                pl.BlockSpec((Bt, T, E), lambda b: (b, 0, 0)),          # x
                pl.BlockSpec((E, qk_cols + v_cols), lambda b: (0, 0)),  # fused W
            ],
            out_specs=pl.BlockSpec((Bt, T, v_cols), lambda b: (b, 0, 0)),
        ),
        compiler_params=pltpu.CompilerParams(
            dimension_semantics=("parallel",)),
    )(x, w_fused)

    return out_padded[..., :E]   # drop lane padding -> (B, T, E)


def reference(x, wq, wk, wv):
    q = x @ wq
    k = x @ wk
    v = x @ wv
    s = q @ jnp.swapaxes(k, -2, -1)
    T = s.shape[-2]
    mask = jnp.triu(jnp.ones((T, T), bool), k=1)
    s = jnp.where(mask, -jnp.inf, s)
    a = jax.nn.softmax(s / (HEAD_SIZE ** 0.5), axis=-1)
    return a @ v


if __name__ == "__main__":
    key = jax.random.PRNGKey(0)
    kx, kq, kk, kv = jax.random.split(key, 4)

    B, T = 2, 8
    x = jax.random.normal(kx, (B, T, EMBEDDING_SIZE), dtype=jnp.float32)

    # nn.Linear(64,16)/(64,16)/(64,64), bias=False — stored as (in, out) so x @ W.
    bound = 1.0 / (EMBEDDING_SIZE ** 0.5)
    wq = jax.random.uniform(kq, (EMBEDDING_SIZE, HEAD_SIZE), jnp.float32, -bound, bound)
    wk = jax.random.uniform(kk, (EMBEDDING_SIZE, HEAD_SIZE), jnp.float32, -bound, bound)
    wv = jax.random.uniform(kv, (EMBEDDING_SIZE, EMBEDDING_SIZE), jnp.float32, -bound, bound)

    out = self_attention(x, wq, wk, wv)
    jax.block_until_ready(out)

    ref = reference(x, wq, wk, wv)
    assert out.shape == (B, T, EMBEDDING_SIZE)
    # approx=True reciprocal (EUP vrcp) adds a tiny per-row scale error, so the
    # tolerance is slightly looser than a pure-f32 comparison would need.
    assert jnp.allclose(out, ref, atol=1e-2, rtol=1e-2), float(jnp.max(jnp.abs(out - ref)))

    print("KERNEL_OK")
</pallas_src>

<mosaic_0001>
module attributes {stable_mosaic.version = 11 : i64} {
  func.func @_attention_kernel(%arg0: i32, %arg1: memref<1x8x64xf32, #tpu.memory_space<vmem>>, %arg2: memref<64x256xf32, #tpu.memory_space<vmem>>, %arg3: memref<1x8x128xf32, #tpu.memory_space<vmem>>) attributes {dimension_semantics = [#tpu.dimension_semantics<parallel>], iteration_bounds = array<i64: 2>, scalar_prefetch = 0 : i64, scratch_operands = 0 : i64, tpu.core_type = #tpu.core_type<tc>, window_params = [{transform_indices = @transform_0, window_bounds = array<i64: 1, 8, 64>}, {pipeline_mode = #tpu.pipeline_mode<synchronous>, transform_indices = @transform_1, window_bounds = array<i64: 64, 256>}, {transform_indices = @transform_2, window_bounds = array<i64: 1, 8, 128>}]} {
    %c0 = arith.constant 0 : index
    %c0_0 = arith.constant 0 : index
    %c0_1 = arith.constant 0 : index
    %0 = vector.load %arg1[%c0, %c0_0, %c0_1] : memref<1x8x64xf32, #tpu.memory_space<vmem>>, vector<1x8x64xf32>
    %1 = vector.shape_cast %0 : vector<1x8x64xf32> to vector<8x64xf32>
    %c0_2 = arith.constant 0 : index
    %c0_3 = arith.constant 0 : index
    %2 = vector.load %arg2[%c0_2, %c0_3] : memref<64x256xf32, #tpu.memory_space<vmem>>, vector<64x256xf32>
    %cst = arith.constant dense<0.000000e+00> : vector<8x256xf32>
    %3 = tpu.matmul %1, %2, %cst {dimension_numbers = #tpu.dot_dimension_numbers<[1], [0], [0], [1], [0, 0, 1, 1], [], []>} : vector<8x64xf32>, vector<64x256xf32>, vector<8x256xf32> -> vector<8x256xf32>
    %4 = vector.extract_strided_slice %3 {offsets = [0, 0], sizes = [8, 16], strides = [1, 1]} : vector<8x256xf32> to vector<8x16xf32>
    %5 = vector.shape_cast %4 : vector<8x16xf32> to vector<1x8x16xf32>
    %6 = vector.extract_strided_slice %3 {offsets = [0, 16], sizes = [8, 16], strides = [1, 1]} : vector<8x256xf32> to vector<8x16xf32>
    %7 = vector.shape_cast %6 : vector<8x16xf32> to vector<1x8x16xf32>
    %8 = vector.extract_strided_slice %3 {offsets = [0, 128], sizes = [8, 128], strides = [1, 1]} : vector<8x256xf32> to vector<8x128xf32>
    %9 = vector.shape_cast %8 : vector<8x128xf32> to vector<1x8x128xf32>
    "tpu.trace_start"() <{level = 10 : i32, message = "bqh,bkh->bqk"}> : () -> ()
    %cst_4 = arith.constant dense<0.000000e+00> : vector<1x8x8xf32>
    %10 = tpu.matmul %5, %7, %cst_4 {dimension_numbers = #tpu.dot_dimension_numbers<[2], [2], [1], [1], [0, 0, 0, 1, 1, 1], [0], [0]>} : vector<1x8x16xf32>, vector<1x8x16xf32>, vector<1x8x8xf32> -> vector<1x8x8xf32>
    "tpu.trace_stop"() : () -> ()
    %11 = tpu.iota {dimensions = array<i32: 1>} : vector<1x8x8xi32>
    %12 = tpu.iota {dimensions = array<i32: 2>} : vector<1x8x8xi32>
    %13 = arith.cmpi sgt, %12, %11 : vector<1x8x8xi32>
    %cst_5 = arith.constant 0xFF800000 : f32
    %14 = vector.broadcast %cst_5 : f32 to vector<1x8x8xf32>
    %15 = arith.select %13, %14, %10 : vector<1x8x8xi1>, vector<1x8x8xf32>
    %cst_6 = arith.constant dense<0xFF800000> : vector<1x8xf32>
    %16 = vector.multi_reduction <maximumf>, %15, %cst_6 [2] : vector<1x8x8xf32> to vector<1x8xf32>
    %17 = vector.shape_cast %16 : vector<1x8xf32> to vector<1x8x1xf32>
    %18 = vector.broadcast %17 : vector<1x8x1xf32> to vector<1x8x8xf32>
    %19 = arith.subf %15, %18 : vector<1x8x8xf32>
    %20 = math.exp %19 : vector<1x8x8xf32>
    %cst_7 = arith.constant dense<0.000000e+00> : vector<1x8xf32>
    %21 = vector.multi_reduction <add>, %20, %cst_7 [2] : vector<1x8x8xf32> to vector<1x8xf32>
    %22 = vector.shape_cast %21 : vector<1x8xf32> to vector<1x8x1xf32>
    %23 = tpu.reciprocal %22 {approx = true} : vector<1x8x1xf32> -> vector<1x8x1xf32>
    %24 = vector.broadcast %23 : vector<1x8x1xf32> to vector<1x8x8xf32>
    %25 = arith.mulf %20, %24 : vector<1x8x8xf32>
    "tpu.trace_start"() <{level = 10 : i32, message = "bqk,bkd->bqd"}> : () -> ()
    %cst_8 = arith.constant dense<0.000000e+00> : vector<1x8x128xf32>
    %26 = tpu.matmul %25, %9, %cst_8 {dimension_numbers = #tpu.dot_dimension_numbers<[2], [1], [1], [2], [0, 0, 0, 1, 1, 2], [0], [0]>} : vector<1x8x8xf32>, vector<1x8x128xf32>, vector<1x8x128xf32> -> vector<1x8x128xf32>
    "tpu.trace_stop"() : () -> ()
    %c0_9 = arith.constant 0 : index
    %c0_10 = arith.constant 0 : index
    %c0_11 = arith.constant 0 : index
    %27 = vector.load %arg3[%c0_9, %c0_10, %c0_11] : memref<1x8x128xf32, #tpu.memory_space<vmem>>, vector<1x8x128xf32>
    tpu.vector_store %arg3[%c0_9, %c0_10, %c0_11], %26 {strides = array<i32>} : memref<1x8x128xf32, #tpu.memory_space<vmem>>, vector<1x8x128xf32>,
    return
  }
  func.func @transform_0(%arg0: i32) -> (i32, i32, i32) {
    %c0_i32 = arith.constant 0 : i32
    %c0_i32_0 = arith.constant 0 : i32
    %c0_i32_1 = arith.constant 0 : i32
    return %arg0, %c0_i32, %c0_i32_0 : i32, i32, i32
  }
  func.func @transform_1(%arg0: i32) -> (i32, i32) {
    %c0_i32 = arith.constant 0 : i32
    %c0_i32_0 = arith.constant 0 : i32
    %c0_i32_1 = arith.constant 0 : i32
    return %c0_i32, %c0_i32_0 : i32, i32
  }
  func.func @transform_2(%arg0: i32) -> (i32, i32, i32) {
    %c0_i32 = arith.constant 0 : i32
    %c0_i32_0 = arith.constant 0 : i32
    %c0_i32_1 = arith.constant 0 : i32
    return %arg0, %c0_i32, %c0_i32_0 : i32, i32, i32
  }
}

</mosaic_0001>

<bundles_post_ra>
// kernel: tpu_custom_call.1
= control target key start
LH: loop header
LB: loop body
LE: loop exit
PB: predicated region body
PF: predicated region fallthrough
CT: control target
= control target key end

     0   :  { %7 = vsyncpa [#allocation3], 0  ;;  %s951_s0 = inlined_call_operand.hbm [shape: f32[2,8,64], index: 0, kind: input, shape index: {}]   ;;  %s952_s1 = inlined_call_operand.hbm [shape: f32[64,256], index: 1, kind: input, shape index: {}]   ;;  %s953_s2 = inlined_call_operand.hbm [shape: f32[2,8,128], index: 2, kind: output, shape index: {}]  }
   0x1   :  { %9 = vsyncpa [#allocation3 + $0x1], 0 }
   0x2   :  { %10 = vsyncpa [#allocation6], 0 }
   0x3   :  { %11 = vsyncpa [#allocation4], 0 }
   0x4   :  { %13 = vsyncpa [#allocation4 + $0x1], 0  ;;  %s775_s9 = smov 0   ;;  %s777_s10 = smov 0  }
   0x5   :  { %s779_s11 = smov 0   ;;  %s781_s12 = smov 0  }
   0x6 LB: > { %s796_s13 = sadd.s32 4294967295, %s750_s12   ;;  %s530_s14 = sadd.s32 4294967294, %s750_s12   ;;  %s750_s12 = sphi %s781_s12, %s975_s12   ;;  %s746_s11 = sphi %s779_s11, %s974_s11   ;;  %s742_s10 = sphi %s777_s10, %s973_s10   ;;  %s738_s9 = sphi %s775_s9, %s972_s9  }
   0x7   : > { %p39_p0 = scmp.ne.s32.totalorder %s742_s10, %s738_s9  ;;  %p954_p1 = scmp.eq.s32.totalorder %s796_s13, 0 }
   0x8   : > { %p90_p3 = scmp.eq.s32.totalorder %s530_s14, 1  ;;  %p531_p5 = scmp.ge.s32.totalorder %s750_s12, 1 }
   0x9   : > { %p805_p4 = por %p954_p1, %p39_p0  ;;  %p97_p7 = scmp.lt.s32.totalorder %s750_s12, 3 }
   0xa   : > { %p810_p6 = por %p90_p3, %p39_p0  ;;  %s752_s18 = smov [#allocation5]  }
   0xb   : > { %s958_s15 = scalar_select %p805_p4, 1, 0 }
   0xc   : > { %s959_s16 = scalar_select %p810_p6, 1, 0 }
   0xd   : > { %p815_p8 = pnand %p531_p5, %p97_p7  ;;  %s109_s19 = sshll.u32 %s752_s18, 4  ;;  %s110_s19 = int_to_ptr.vmem [resolvable:$true] %s109_s19 }
   0xe   : > { %s829_s21 = sadd.s32 1, %s750_s12   ;;  %s26_s22 = sadd.s32 1, %s746_s11 }
   0xf   : > { %s960_s17 = scalar_select %p815_p8, 1, 0 }
  0x10   : > { %p570_p9 = pneg %p815_p8  ;;  %s23_s23 = ssub.s32 %s750_s12, %s829_s21 }
  0x11   : > { %s639_s24 = scalar_lea.vmem %s110_s19, 2048  ;;  %p647_p5 = scmp.lt.s32.totalorder %s110_s19, %s110_s19 }
  0x12   : > { %p824_p11 = pnand %p570_p9, %p954_p1  ;;  %p640_p13 = scmp.ne.s32.totalorder %s110_s19, %s639_s24 }
  0x13   : > { %p648_p7 = scmp.lt.s32.totalorder %s639_s24, %s639_s24 }
  0x14   : > { %p630_p12 = pneg %p824_p11 }
  0x15   : > { %p649_p10 = por %p648_p7, %p647_p5 }
  0x16   : > { %p642_p0 = pnand %p640_p13, %p630_p12 }
  0x18   : > { %p643_p3 = pneg %p642_p0 }
  0x1a   : > { %p650_p2 = pnand %p649_p10, %p643_p3 }
  0x1c   : > { %653 = shalt.err (!%p650_p2)
}
  0x1d   : > { %s753_s25 = smov 256   ;;  %s754_s26 = smov 16  }
  0x1e   : > { %573 = dma.hbm_to_vmem [thread:$0]  (!%p824_p11), %s952_s1, 2048, %s110_s19, [#allocation6], %s753_s25, %s753_s25, %s754_s26  }
  0x1f   : > { %p24_p9 = scmp.eq.s32.totalorder %s23_s23, 0  ;;  %p33_p12 = scmp.ne.s32.totalorder %s746_s11, %s742_s10 }
  0x20   : > { %p34_p10 = scmp.eq.s32.totalorder %s750_s12, 0  ;;  %p583_p2 = scmp.lt.s32.totalorder %s750_s12, 2 }
  0x21   : > { %s846_s29 = scalar_select %p24_p9, %s746_s11, %s26_s22  }
  0x22   : > { %p35_p13 = por %p34_p10, %p33_p12  ;;  %p962_p0 = scmp.eq.s32.totalorder %s796_s13, 1 }
  0x23   : > { %s123_s3 = sand.u32 1, %s746_s11   ;;  %s535_s4 = sshll.u32 %s750_s12, 7 }
  0x24   : > { %p850_p3 = por %p962_p0, %p33_p12  ;;  %s534_s5 = sshll.u32 %s123_s3, 3 }
  0x25   : > { %s859_s8 = scalar_lea.hbm %s951_s0, %s535_s4  ;;  %s127_s14 = scalar_lea.vmem [#allocation2], %s534_s5 }
  0x26   : > { %s963_s30 = scalar_select %p850_p3, 1, 0 }
  0x27   : > { %s134_s18 = sshll.u32 %s127_s14, 4  ;;  %p861_p11 = pnand %p583_p2, %p35_p13  ;;  %s135_s18 = int_to_ptr.vmem [resolvable:$true] %s134_s18 }
  0x28   : > { %s124_s20 = scalar_lea.sflag [#allocation3], %s123_s3  ;;  %s654_s22 = scalar_lea.hbm %s859_s8, 128 }
  0x29   : > { %p655_p5 = scmp.ne.s32.totalorder %s859_s8, %s654_s22  ;;  %p656_p7 = pneg %p861_p11 }
  0x2a   : > { %s659_s25 = scalar_lea.hbm %s951_s0, 256  ;;  %p660_p10 = scmp.lt.s32.totalorder %s859_s8, %s951_s0 }
  0x2b   : > { %p657_p9 = pnand %p656_p7, %p655_p5  ;;  %p661_p2 = scmp.lt.s32.totalorder %s659_s25, %s654_s22 }
  0x2d   : > { %p658_p12 = pneg %p657_p9  ;;  %p662_p13 = por %p661_p2, %p660_p10 }
  0x2f   : > { %p663_p0 = pnand %p662_p13, %p658_p12 }
  0x31   : > { %666 = shalt.err (!%p663_p0)
}
  0x32   : > { %s667_s28 = scalar_lea.vmem %s135_s18, 128  ;;  %s755_s3 = smov [#allocation2]  }
  0x33   : > { %p668_p1 = scmp.ne.s32.totalorder %s135_s18, %s667_s28  ;;  %s672_s4 = sshll.u32 %s755_s3, 4  ;;  %s673_s4 = int_to_ptr.vmem [resolvable:$false] %s672_s4 }
  0x34   : > { %s674_s5 = scalar_lea.vmem %s673_s4, 256  ;;  %p675_p5 = scmp.lt.s32.totalorder %s135_s18, %s673_s4 }
  0x35   : > { %p670_p6 = pnand %p668_p1, %p656_p7  ;;  %p676_p9 = scmp.lt.s32.totalorder %s674_s5, %s667_s28 }
  0x37   : > { %p671_p3 = pneg %p670_p6  ;;  %p677_p4 = por %p676_p9, %p675_p5 }
  0x39   : > { %p678_p8 = pnand %p677_p4, %p671_p3 }
  0x3b   : > { %681 = shalt.err (!%p678_p8)
}
  0x3c   : > { %577 = dma.hbm_to_vmem [thread:$0]  (!%p861_p11), %s859_s8, 128, %s135_s18, %s124_s20  }
  0x3d   : > { %p965_p12 = scmp.ne.s32.totalorder %s960_s17, 0 }
  0x3e   : > { %s882_s6 = sand.u32 (!%p965_p12), 1, %s742_s10   ;;  %p966_p1 = scmp.ne.s32.totalorder (!%p965_p12), %s958_s15, 0 }
  0x3f   : > { %143 = sbr.rel (%p965_p12) target bundleno = 1114 (0x45a), region = 28  ;;  %s537_s7 = sshll.u32 (!%p965_p12), %s882_s6, 3 }
  0x40   : > { %s146_s14 = scalar_lea.sflag (!%p965_p12), [#allocation3], %s882_s6  ;;  %s888_s22 = scalar_lea.vmem (!%p965_p12), [#allocation2], %s537_s7 }
  0x44   : > { %725 = dma.done.wait (%p966_p1), %s146_s14, 128  }
  0x45   : > { %727 = vsyncadd (%p966_p1), %s146_s14, 4294967168  ;;  %p967_p4 = scmp.eq.s32.totalorder %s796_s13, 0 }
  0x47   : > { %729 = dma.done.wait (%p967_p4), [#allocation6], 2048   ;;  %p968_p6 = pmov %p967_p4 }
  0x48   : > { %v756_v0 = vmov 0.0   ;;  %v190_v1 = vld [vmem:[#allocation5 + $0x78] sm:$0xff]  ;;  %v189_v2 = vld [vmem:[#allocation5 + $0x70] sm:$0xff]  ;;  %v188_v3 = vld [vmem:[#allocation5 + $0x68] sm:$0xff]  ;;  %vm191_vm0 = vcmask 523264   ;;  %vm757_vm1 = vmmov 0   ;;  %v344_v21 = vlaneseq }
  0x49   : > { %731 = vsyncadd (%p968_p6), [#allocation6], 4294965248  ;;  %259 = vmatprep.mubr.f32.mxu0 %v756_v0  ;;  %552 = vmatprep.subr.mxu1 %v756_v0  ;;  %v187_v4 = vld [vmem:[#allocation5 + $0x60] sm:$0xff]  ;;  %v186_v5 = vld [vmem:[#allocation5 + $0x58] sm:$0xff]  ;;  %s758_s15 = smov 112   ;;  %vm269_vm2 = vcmask 130048  }
  0x4a   : > { %211 = vmatprep.subr.mxu0 %v190_v1  ;;  %v185_v6 = vld [vmem:[#allocation5 + $0x50] sm:$0xff]  ;;  %v184_v7 = vld [vmem:[#allocation5 + $0x48] sm:$0xff]  ;;  %v183_v8 = vld [vmem:[#allocation5 + $0x40] sm:$0xff]  ;;  %554 = vmatprep.mubr.msk.f32.mxu1 %vm757_vm1, %v756_v0  ;;  %v345_v22 = vshrl.u32 %v344_v21, 7  ;;  %v347_v23 = vand.u32 127, %v344_v21  ;;  %vm350_vm4 = vcmask 64512  }
  0x4b   : > { %212 = vmatpush1.msra.mxu0 %v189_v2  ;;  %v182_v9 = vld [vmem:[#allocation5 + $0x38] sm:$0xff]  ;;  %v181_v10 = vld [vmem:[#allocation5 + $0x30] sm:$0xff]  ;;  %v180_v11 = vld [vmem:[#allocation5 + $0x28] sm:$0xff]  ;;  %s173_s17 = scalar_lea.vmem [#allocation7], %s537_s7  ;;  %s545_s18 = sshll.u32 %s796_s13, 7 }
  0x4c   : > { %213 = vmatprep.subr.mxu0 %v188_v3  ;;  %v179_v12 = vld [vmem:[#allocation5 + $0x20] sm:$0xff]  ;;  %v178_v13 = vld [vmem:[#allocation5 + $0x18] sm:$0xff]  ;;  %v177_v14 = vld [vmem:[#allocation5 + $0x10] sm:$0xff]  ;;  %vm348_vm3 = vcmp.gt.s32.totalorder %v347_v23, %v345_v22  ;;  %s450_s8 = sshll.u32 %s173_s17, 4  ;;  %s910_s23 = scalar_lea.hbm %s953_s2, %s545_s18  ;;  %s905_s8 = int_to_ptr.vmem [resolvable:$true] %s450_s8 }
  0x4d   : > { %214 = vmatpush1.msra.mxu0 %v187_v4  ;;  %v176_v15 = vld [vmem:[#allocation5 + $0x8] sm:$0xff]  ;;  %v175_v16 = vld [vmem:[#allocation5] sm:$0xff]  ;;  %v174_v17 = vld [vmem:[%s888_s22] sm:$0xff]  ;;  %s437_s24 = scalar_lea.sflag [#allocation4], %s882_s6  ;;  %s682_s25 = scalar_lea.vmem %s905_s8, 128 }
  0x4e   : > { %215 = vmatprep.subr.mxu0 %v186_v5  ;;  %p683_p8 = scmp.ne.s32.totalorder %s905_s8, %s682_s25  ;;  %p969_p3 = scmp.ne.s32.totalorder %s963_s30, 0 }
  0x4f   : > { %216 = vmatpush1.msra.mxu0 %v185_v6  ;;  %s759_s13 = smov [#allocation7]  }
  0x50   : > { %217 = vmatprep.subr.mxu0 %v184_v7  ;;  %p684_p11 = pnand %p683_p8, %p969_p3  ;;  %s686_s26 = sshll.u32 %s759_s13, 4  ;;  %s687_s26 = int_to_ptr.vmem [resolvable:$false] %s686_s26 }
  0x51   : > { %218 = vmatpush1.msra.mxu0 %v183_v8  ;;  %s688_s27 = scalar_lea.vmem %s687_s26, 256  ;;  %p689_p10 = scmp.lt.s32.totalorder %s905_s8, %s687_s26 }
  0x52   : > { %219 = vmatprep.subr.mxu0 %v182_v9  ;;  %p685_p7 = pneg %p684_p11  ;;  %p690_p2 = scmp.lt.s32.totalorder %s688_s27, %s682_s25 }
  0x53   : > { %220 = vmatpush1.msra.mxu0 %v181_v10 }
  0x54   : > { %221 = vmatprep.subr.mxu0 %v180_v11  ;;  %p691_p13 = por %p690_p2, %p689_p10 }
  0x55   : > { %222 = vmatpush1.msra.mxu0 %v179_v12 }
  0x56   : > { %223 = vmatprep.subr.mxu0 %v178_v13  ;;  %p692_p0 = pnand %p691_p13, %p685_p7 }
  0x57   : > { %224 = vmatpush1.msra.mxu0 %v177_v14 }
  0x58   : > { %225 = vmatprep.subr.mxu0 %v176_v15 }
  0x59   : > { %226 = vmatpush1.msra.mxu0 %v175_v16 }
  0x5a   : > { %540 = vmatmul.mubr.msk.f32.vlgmr.msra.gmra.mxu0 %vm191_vm0, %v174_v17 }
 0x11a   : > { %v261_v18 = vpop.f32.mrf.mxu0 }
 0x11b   : > { %267 = vrot.lane.b32.xlu0 %v261_v18, %s758_s15 }
 0x11c   : > { %v263_v20 = vpop.f32.mrf.mxu0 }
 0x18d   : > { %v268_v19 = vpop.permute.xlu0 %267 }
 0x18e   : > { %553 = vmatpush3.xpose.msk.msra.mxu1 %vm269_vm2, %v268_v19 }
 0x18f   : > { %557 = vmatprep.subr.mxu1 %v756_v0 }
 0x191   : > { %555 = vmatmul.mubr.msk.f32.vlgmr.msra.gmra.mxu1 %vm269_vm2, %v261_v18 }
 0x192   : > { %558 = vmatpush3.msra.mxu1 %v263_v20  ;;  %559 = vmatprep.mubr.msk.f32.mxu1 %vm757_vm1, %v756_v0 }
 0x251   : > { %v340_v24 = vpop.f32.mrf.mxu1 }
 0x252   : > { %v349_v25 = vsel %vm348_vm3, -inf, %v340_v24 }
 0x253   : > { %v556_v26 = vpop.f32.mrf.mxu1  ;;  %v351_v27 = vsel %vm350_vm4, %v349_v25, -inf }
 0x254   : > { %352 = vmax.xlane.f32.xlu0 %v351_v27 }
 0x2dd   : > { %v353_v28 = vpop.xlane.xlu0 %352 }
 0x2de   : > { %v354_v29 = vsub.f32 %v349_v25, %v353_v28 }
 0x2e0   : > { %v355_v30 = vmul.f32 1.442695, %v354_v29 }
 0x2e2   : > { %624 = vpow2.f32 %v355_v30 }
 0x2ef   : > { %v625_v31 = vpop.eup %624 }
 0x2f0   : > { %v357_v32 = vsel %vm350_vm4, %v625_v31, 0.0 }
 0x2f1   : > { %358 = vadd.xlane.f32.xlu1 %v357_v32 }
 0x37a   : > { %v359_v33 = vpop.xlane.xlu1 %358 }
 0x37b   : > { %626 = vrcp.f32 %v359_v33 }
 0x388   : > { %v627_v34 = vpop.eup %626 }
 0x389   : > { %v361_v35 = vmul.f32 %v627_v34, %v625_v31 }
 0x38b   : > { %560 = vmatmul.mubr.msk.f32.vlgmr.msra.gmra.mxu1 %vm350_vm4, %v361_v35 }
 0x44b   : > { %v431_v36 = vpop.f32.mrf.mxu1 }
 0x44c   : > { %435 = vst [vmem:[%s173_s17] sm:$0xff] %v431_v36 }
 0x44d   : > { %v561_v37 = vpop.f32.mrf.mxu1 }
 0x44e   : > { %695 = shalt.err (!%p692_p0)
}
 0x44f   : > { %s696_s28 = scalar_lea.hbm %s910_s23, 128  ;;  %s700_s5 = scalar_lea.hbm %s953_s2, 256 }
 0x450   : > { %p697_p5 = scmp.ne.s32.totalorder %s910_s23, %s696_s28  ;;  %p701_p1 = scmp.lt.s32.totalorder %s910_s23, %s953_s2 }
 0x451   : > { %p702_p4 = scmp.lt.s32.totalorder %s700_s5, %s696_s28 }
 0x452   : > { %p698_p9 = pnand %p697_p5, %p969_p3 }
 0x453   : > { %p703_p6 = por %p702_p4, %p701_p1 }
 0x454   : > { %p699_p12 = pneg %p698_p9 }
 0x456   : > { %p704_p8 = pnand %p703_p6, %p699_p12 }
 0x458   : > { %707 = shalt.err (!%p704_p8)
}
 0x459   : > { %568 = dma.vmem_to_hbm [thread:$0]  (%p969_p3), %s905_s8, 128, %s910_s23, %s437_s24  }
 0x45a PF: > { %s462_s14 = sand.u32 1, %s738_s9   ;;  %p970_p11 = scmp.ne.s32.totalorder %s959_s16, 0 }
 0x45b   : > { %p971_p7 = scmp.ge.s32.totalorder %s750_s12, 2  ;;  %s463_s22 = scalar_lea.sflag [#allocation4], %s462_s14 }
 0x45d   : > { %p579_p10 = pnand %p971_p7, %p970_p11 }
 0x45f   : > { %p580_p2 = pneg %p579_p10 }
 0x461   : > { %733 = dma.done.wait (%p580_p2), %s463_s22, 128  }
 0x462   : > { %735 = vsyncadd (%p580_p2), %s463_s22, 4294967168  ;;  %p16_p13 = scmp.ge.s32.totalorder %s829_s21, 4   ;;  %s972_s9 = smov %s742_s10 }
 0x463   : > { %s973_s10 = smov %s746_s11  ;;  %s974_s11 = smov %s846_s29 }
 0x464   : > { %s975_s12 = smov %s829_s21  ;;  %18 = sbr.rel (!%p16_p13) target bundleno = 6 (0x6), region = 77 }
 0x469   :  { %468 = vsyncpa [#allocation3], 1 }
 0x46a   :  { %470 = vsyncpa [#allocation3 + $0x1], 1 }
 0x46b   :  { %471 = vsyncpa [#allocation6], 1 }
 0x46c   :  { %472 = vsyncpa [#allocation4], 1 }
 0x46d   :  { %474 = vsyncpa [#allocation4 + $0x1], 1 }

</bundles_post_ra>
